<compile_context>
chip_gen: v6e
topology: v6e:2x2x1
jax: 0.10.0
libtpu: 0.0.40
codegen_flags: <defaults>
</compile_context>

<pallas_src>
import jax
import jax.numpy as jnp
from jax import lax
from jax.experimental import pallas as pl
from jax.experimental.pallas import tpu as pltpu


def _round_up(x, m):
    return (x + m - 1) // m * m


def _pick_tile(dim, candidates):
    for c in candidates:
        if dim % c == 0:
            return c
    return dim


# ----------------------------------------------------------------------------
# Fused kernel: dense projection + tanh + masked sum pool + L2 normalize
#
# Grid: (B, Sp // tS)   -- batch parallel, sequence (reduction) axis last
#   mask_ref : [tS, 1]   f32   (1.0 real token, 0.0 pad / S-padding)
#   x_ref    : [tS, Kp]  bf16  (embedding rows for this (batch, s) tile)
#   w_ref    : [Kp, Hp]  bf16  (whole weight, VMEM-resident, fetched once)
#   b_ref    : [1, Hp]   f32
#   o_ref    : [1, Hp]   f32   (written only on the final S step)
# Scratch:
#   pool_acc : [1, Hp]   f32   masked-sum accumulator over S tiles
# ----------------------------------------------------------------------------
def _fused_kernel(mask_ref, x_ref, w_ref, b_ref, o_ref, pool_acc):
    si = pl.program_id(1)
    n_s = pl.num_programs(1)

    # bf16 MXU matmul over the full K, f32 accumulation, fused f32 epilogue.
    hidden = jnp.tanh(
        jnp.dot(x_ref[...], w_ref[...], preferred_element_type=jnp.float32)
        + b_ref[...]
    )                                                          # [tS, Hp]

    # Masked sum over the sequence on the VPU (broadcast mul) + XLU sublane
    # reduce -- no MXU involvement.
    partial = jnp.sum(hidden * mask_ref[...], axis=0, keepdims=True)  # [1, Hp]

    @pl.when(si == 0)
    def _():
        pool_acc[...] = partial          # direct write, no zero-fill store

    @pl.when(si > 0)
    def _():
        pool_acc[...] += partial

    @pl.when(si == n_s - 1)
    def _():
        # L2 normalize is scale-invariant -> normalize the raw masked sum
        # directly (the division by the token count cancels).
        # TODO(synk): exact parity with torch's max(norm, 1e-12) clamp on
        #             all-padding rows would need the count folded into eps;
        #             degenerate rows still produce 0 here either way.
        pooled = pool_acc[...]
        ssq = jnp.sum(pooled * pooled, axis=-1, keepdims=True)
        o_ref[...] = pooled * lax.rsqrt(jnp.maximum(ssq, 1e-24))


def _fused_encode_pool_normalize(mask_col, emb, w, b, tS):
    B, Sp, _ = mask_col.shape
    Kp, Hp = w.shape
    grid = (B, Sp // tS)

    return pl.pallas_call(
        _fused_kernel,
        out_shape=jax.ShapeDtypeStruct((B, 1, Hp), jnp.float32),
        grid_spec=pltpu.PrefetchScalarGridSpec(
            num_scalar_prefetch=0,
            grid=grid,
            in_specs=[
                pl.BlockSpec((None, tS, 1), lambda bi, si: (bi, si, 0)),
                pl.BlockSpec((None, tS, Kp), lambda bi, si: (bi, si, 0)),
                # Constant block index => W is DMA'd once and stays resident.
                pl.BlockSpec((Kp, Hp), lambda bi, si: (0, 0)),
                pl.BlockSpec((1, Hp), lambda bi, si: (0, 0)),
            ],
            out_specs=pl.BlockSpec((None, 1, Hp), lambda bi, si: (bi, 0, 0)),
            scratch_shapes=[
                pltpu.VMEM((1, Hp), jnp.float32),    # pool_acc
            ],
        ),
        compiler_params=pltpu.CompilerParams(
            dimension_semantics=("parallel", "arbitrary"),
            # Small, generation-safe budget (v7x has only 64 MiB physical).
            # TODO(synk): for very large Hp on v7x, tile Hp instead of
            #             keeping W whole, and re-derive this limit.
            vmem_limit_bytes=32 * 1024 * 1024,
        ),
    )(mask_col, emb, w, b)


# ----------------------------------------------------------------------------
# Model wrapper (mirrors Model.forward)
# ----------------------------------------------------------------------------
def model_forward(params, code_inputs=None, nl_inputs=None):
    inputs = code_inputs if code_inputs is not None else nl_inputs
    B, S = inputs.shape
    Hin, Hout = params["w"].shape

    # code_inputs.ne(1) -> float mask
    mask = (inputs != 1).astype(jnp.float32)                       # [B, S]

    # Encoder stand-in embedding gather; cast to bf16 AFTER the gather so the
    # full vocab table is never rewritten in HBM.
    emb = jnp.take(params["embed"], inputs, axis=0).astype(jnp.bfloat16)

    # Pad to lane/sublane-friendly 128-multiples (masked / zero padding).
    Sp = _round_up(S, 128)
    Kp = _round_up(Hin, 128)
    Hp = _round_up(Hout, 128)
    tS = _pick_tile(Sp, (512, 256, 128))

    # Mask as a [B, Sp, 1] column so the kernel pools on the VPU/XLU.
    mask_col = jnp.pad(mask, ((0, 0), (0, Sp - S))).reshape(B, Sp, 1)
    emb_p = jnp.pad(emb, ((0, 0), (0, Sp - S), (0, Kp - Hin)))
    w_p = jnp.pad(params["w"].astype(jnp.bfloat16),
                  ((0, Kp - Hin), (0, Hp - Hout)))
    b_p = jnp.pad(params["b"].astype(jnp.float32),
                  ((0, 0), (0, Hp - Hout)))

    out_p = _fused_encode_pool_normalize(mask_col, emb_p, w_p, b_p, tS)
    return out_p.reshape(B, Hp)[:, :Hout]                         # [B, H]


if __name__ == "__main__":
    B, S, H, VOCAB = 2, 8, 32, 50

    key = jax.random.PRNGKey(0)
    k_emb, k_w, k_b, k_ids = jax.random.split(key, 4)

    params = {
        "embed": jax.random.normal(k_emb, (VOCAB, H), dtype=jnp.float32) * 0.1,
        "w": jax.random.normal(k_w, (H, H), dtype=jnp.float32) * 0.1,
        "b": jax.random.normal(k_b, (1, H), dtype=jnp.float32) * 0.1,
    }

    ids = jax.random.randint(k_ids, (B, S), 0, VOCAB, dtype=jnp.int32)
    # token id 1 is the padding token (matching .ne(1) in the module)
    ids = ids.at[:, -2:].set(1)

    out = model_forward(params, code_inputs=ids)
    jax.block_until_ready(out)

    # Pure-JAX reference with identical bf16 matmul inputs / f32 accumulation.
    emb_ref = jnp.take(params["embed"], ids, axis=0).astype(jnp.bfloat16)
    hid_ref = jnp.tanh(
        jnp.dot(emb_ref.reshape(B * S, H), params["w"].astype(jnp.bfloat16),
                preferred_element_type=jnp.float32).reshape(B, S, H)
        + params["b"]
    )
    m_ref = (ids != 1).astype(jnp.float32)
    pooled_ref = (hid_ref * m_ref[:, :, None]).sum(1) / jnp.maximum(
        m_ref.sum(-1, keepdims=True), 1.0)
    nrm_ref = jnp.sqrt(jnp.sum(pooled_ref * pooled_ref, axis=1, keepdims=True))
    ref = pooled_ref / jnp.maximum(nrm_ref, 1e-12)

    assert out.shape == (B, H)
    norms = jnp.sqrt(jnp.sum(out * out, axis=1))
    assert jnp.allclose(norms, 1.0, atol=1e-5)
    assert jnp.allclose(out, ref, atol=1e-4, rtol=1e-4)

    print("KERNEL_OK")
</pallas_src>

<mosaic_0001>
module attributes {stable_mosaic.version = 11 : i64} {
  func.func @_fused_kernel(%arg0: i32, %arg1: i32, %arg2: memref<1x128x1xf32, #tpu.memory_space<vmem>>, %arg3: memref<1x128x128xbf16, #tpu.memory_space<vmem>>, %arg4: memref<128x128xbf16, #tpu.memory_space<vmem>>, %arg5: memref<1x128xf32, #tpu.memory_space<vmem>>, %arg6: memref<1x1x128xf32, #tpu.memory_space<vmem>>, %arg7: memref<1x128xf32, #tpu.memory_space<vmem>>) attributes {dimension_semantics = [#tpu.dimension_semantics<parallel>, #tpu.dimension_semantics<arbitrary>], iteration_bounds = array<i64: 2, 1>, scalar_prefetch = 0 : i64, scratch_operands = 1 : i64, tpu.core_type = #tpu.core_type<tc>, window_params = [{transform_indices = @transform_0, window_bounds = array<i64: 1, 128, 1>}, {transform_indices = @transform_1, window_bounds = array<i64: 1, 128, 128>}, {pipeline_mode = #tpu.pipeline_mode<synchronous>, transform_indices = @transform_2, window_bounds = array<i64: 128, 128>}, {pipeline_mode = #tpu.pipeline_mode<synchronous>, transform_indices = @transform_3, window_bounds = array<i64: 1, 128>}, {transform_indices = @transform_4, window_bounds = array<i64: 1, 1, 128>}]} {
    %c0 = arith.constant 0 : index
    %c0_0 = arith.constant 0 : index
    %c0_1 = arith.constant 0 : index
    %0 = vector.load %arg3[%c0, %c0_0, %c0_1] : memref<1x128x128xbf16, #tpu.memory_space<vmem>>, vector<1x128x128xbf16>
    %1 = vector.shape_cast %0 : vector<1x128x128xbf16> to vector<128x128xbf16>
    %c0_2 = arith.constant 0 : index
    %c0_3 = arith.constant 0 : index
    %2 = vector.load %arg4[%c0_2, %c0_3] : memref<128x128xbf16, #tpu.memory_space<vmem>>, vector<128x128xbf16>
    %cst = arith.constant dense<0.000000e+00> : vector<128x128xf32>
    %3 = tpu.matmul %1, %2, %cst {dimension_numbers = #tpu.dot_dimension_numbers<[1], [0], [0], [1], [0, 0, 1, 1], [], []>} : vector<128x128xbf16>, vector<128x128xbf16>, vector<128x128xf32> -> vector<128x128xf32>
    %c0_4 = arith.constant 0 : index
    %c0_5 = arith.constant 0 : index
    %4 = vector.load %arg5[%c0_4, %c0_5] : memref<1x128xf32, #tpu.memory_space<vmem>>, vector<1x128xf32>
    %5 = vector.broadcast %4 : vector<1x128xf32> to vector<128x128xf32>
    %6 = arith.addf %3, %5 : vector<128x128xf32>
    %7 = math.tanh %6 : vector<128x128xf32>
    %c0_6 = arith.constant 0 : index
    %c0_7 = arith.constant 0 : index
    %c0_8 = arith.constant 0 : index
    %8 = vector.load %arg2[%c0_6, %c0_7, %c0_8] : memref<1x128x1xf32, #tpu.memory_space<vmem>>, vector<1x128x1xf32>
    %9 = vector.shape_cast %8 : vector<1x128x1xf32> to vector<128x1xf32>
    %10 = vector.broadcast %9 : vector<128x1xf32> to vector<128x128xf32>
    %11 = arith.mulf %7, %10 : vector<128x128xf32>
    %cst_9 = arith.constant dense<0.000000e+00> : vector<128xf32>
    %12 = vector.multi_reduction <add>, %11, %cst_9 [0] : vector<128x128xf32> to vector<128xf32>
    %13 = vector.shape_cast %12 : vector<128xf32> to vector<1x128xf32>
    %c0_i32 = arith.constant 0 : i32
    %14 = arith.cmpi eq, %arg1, %c0_i32 : i32
    %15 = arith.extui %14 : i1 to i32
    %c0_i32_10 = arith.constant 0 : i32
    %16 = arith.cmpi ne, %15, %c0_i32_10 : i32
    scf.if %16 {
      %c0_15 = arith.constant 0 : index
      %c0_16 = arith.constant 0 : index
      %23 = vector.load %arg7[%c0_15, %c0_16] : memref<1x128xf32, #tpu.memory_space<vmem>>, vector<1x128xf32>
      tpu.vector_store %arg7[%c0_15, %c0_16], %13 {strides = array<i32>} : memref<1x128xf32, #tpu.memory_space<vmem>>, vector<1x128xf32>,
    } else {
    }
    %c0_i32_11 = arith.constant 0 : i32
    %17 = arith.cmpi sgt, %arg1, %c0_i32_11 : i32
    %18 = arith.extui %17 : i1 to i32
    %c0_i32_12 = arith.constant 0 : i32
    %19 = arith.cmpi ne, %18, %c0_i32_12 : i32
    scf.if %19 {
      %c0_15 = arith.constant 0 : index
      %c0_16 = arith.constant 0 : index
      %23 = vector.load %arg7[%c0_15, %c0_16] : memref<1x128xf32, #tpu.memory_space<vmem>>, vector<1x128xf32>
      %24 = arith.addf %23, %13 : vector<1x128xf32>
      %c0_17 = arith.constant 0 : index
      %c0_18 = arith.constant 0 : index
      %25 = vector.load %arg7[%c0_17, %c0_18] : memref<1x128xf32, #tpu.memory_space<vmem>>, vector<1x128xf32>
      tpu.vector_store %arg7[%c0_17, %c0_18], %24 {strides = array<i32>} : memref<1x128xf32, #tpu.memory_space<vmem>>, vector<1x128xf32>,
    } else {
    }
    %c0_i32_13 = arith.constant 0 : i32
    %20 = arith.cmpi eq, %arg1, %c0_i32_13 : i32
    %21 = arith.extui %20 : i1 to i32
    %c0_i32_14 = arith.constant 0 : i32
    %22 = arith.cmpi ne, %21, %c0_i32_14 : i32
    scf.if %22 {
      %c0_15 = arith.constant 0 : index
      %c0_16 = arith.constant 0 : index
      %23 = vector.load %arg7[%c0_15, %c0_16] : memref<1x128xf32, #tpu.memory_space<vmem>>, vector<1x128xf32>
      %24 = arith.mulf %23, %23 : vector<1x128xf32>
      %cst_17 = arith.constant dense<0.000000e+00> : vector<1xf32>
      %25 = vector.multi_reduction <add>, %24, %cst_17 [1] : vector<1x128xf32> to vector<1xf32>
      %26 = vector.shape_cast %25 : vector<1xf32> to vector<1x1xf32>
      %cst_18 = arith.constant 1.000000e-24 : f32
      %27 = vector.broadcast %cst_18 : f32 to vector<1x1xf32>
      %28 = arith.maximumf %26, %27 : vector<1x1xf32>
      %29 = math.rsqrt %28 : vector<1x1xf32>
      %30 = vector.broadcast %29 : vector<1x1xf32> to vector<1x128xf32>
      %31 = arith.mulf %23, %30 : vector<1x128xf32>
      %c0_19 = arith.constant 0 : index
      %c0_20 = arith.constant 0 : index
      %c0_21 = arith.constant 0 : index
      %32 = vector.load %arg6[%c0_19, %c0_20, %c0_21] : memref<1x1x128xf32, #tpu.memory_space<vmem>>, vector<1x1x128xf32>
      %33 = vector.shape_cast %32 : vector<1x1x128xf32> to vector<1x128xf32>
      %34 = vector.shape_cast %31 : vector<1x128xf32> to vector<1x1x128xf32>
      tpu.vector_store %arg6[%c0_19, %c0_20, %c0_21], %34 {strides = array<i32>} : memref<1x1x128xf32, #tpu.memory_space<vmem>>, vector<1x1x128xf32>,
    } else {
    }
    return
  }
  func.func @transform_0(%arg0: i32, %arg1: i32) -> (i32, i32, i32) {
    %c0_i32 = arith.constant 0 : i32
    %c0_i32_0 = arith.constant 0 : i32
    return %arg0, %arg1, %c0_i32 : i32, i32, i32
  }
  func.func @transform_1(%arg0: i32, %arg1: i32) -> (i32, i32, i32) {
    %c0_i32 = arith.constant 0 : i32
    %c0_i32_0 = arith.constant 0 : i32
    return %arg0, %arg1, %c0_i32 : i32, i32, i32
  }
  func.func @transform_2(%arg0: i32, %arg1: i32) -> (i32, i32) {
    %c0_i32 = arith.constant 0 : i32
    %c0_i32_0 = arith.constant 0 : i32
    %c0_i32_1 = arith.constant 0 : i32
    return %c0_i32, %c0_i32_0 : i32, i32
  }
  func.func @transform_3(%arg0: i32, %arg1: i32) -> (i32, i32) {
    %c0_i32 = arith.constant 0 : i32
    %c0_i32_0 = arith.constant 0 : i32
    %c0_i32_1 = arith.constant 0 : i32
    return %c0_i32, %c0_i32_0 : i32, i32
  }
  func.func @transform_4(%arg0: i32, %arg1: i32) -> (i32, i32, i32) {
    %c0_i32 = arith.constant 0 : i32
    %c0_i32_0 = arith.constant 0 : i32
    %c0_i32_1 = arith.constant 0 : i32
    return %arg0, %c0_i32, %c0_i32_0 : i32, i32, i32
  }
}

</mosaic_0001>

<bundles_post_ra>
// kernel: tpu_custom_call.1
= control target key start
LH: loop header
LB: loop body
LE: loop exit
PB: predicated region body
PF: predicated region fallthrough
CT: control target
= control target key end

     0   :  { %9 = vsyncpa [#allocation4], 0  ;;  %s1249_s0 = inlined_call_operand.vmem [shape: f32[2,128,1], index: 0, kind: input, shape index: {}]   ;;  %s1250_s1 = inlined_call_operand.vmem [shape: bf16[2,128,128], index: 1, kind: input, shape index: {}]   ;;  %s1251_s2 = inlined_call_operand.vmem [shape: bf16[128,128], index: 2, kind: input, shape index: {}]   ;;  %s1252_s3 = inlined_call_operand.vmem [shape: f32[1,128], index: 3, kind: input, shape index: {}]   ;;  %s1253_s4 = inlined_call_operand.hbm [shape: f32[2,1,128], index: 4, kind: output, shape index: {}]  }
   0x1   :  { %11 = vsyncpa [#allocation4 + $0x1], 0  ;;  %s1074_s15 = smov 0   ;;  %s1076_s16 = smov 0  }
   0x2   :  { %s1078_s17 = smov 0   ;;  %s1080_s18 = smov 0  }
   0x3   :  { %s1082_s19 = smov 0   ;;  %s1084_s20 = smov 0  }
   0x4 LB: > { %s766_s21 = sadd.s32 4294967295, %s1045_s20   ;;  %s767_s22 = sadd.s32 4294967294, %s1045_s20   ;;  %s1045_s20 = sphi %s1084_s20, %s17_s20   ;;  %s1041_s19 = sphi %s1082_s19, %s1260_s19   ;;  %s1037_s18 = sphi %s1080_s18, %s1259_s18   ;;  %s1033_s17 = sphi %s1078_s17, %s1258_s17   ;;  %s1029_s16 = sphi %s1076_s16, %s1257_s16   ;;  %s1025_s15 = sphi %s1074_s15, %s1256_s15  }
   0x5   : > { %s29_s23 = sadd.s32 1, %s1041_s19  ;;  %s134_s24 = sadd.s32 1, %s1033_s17 }
   0x6   : > { %p31_p0 = scmp.ge.s32.totalorder %s29_s23, 2  ;;  %p144_p1 = scmp.ne.s32.totalorder %s1033_s17, %s1029_s16 }
   0x7   : > { %p145_p2 = scmp.eq.s32.totalorder %s766_s21, 1  ;;  %p150_p3 = scmp.ne.s32.totalorder %s1029_s16, %s1025_s15 }
   0x8   : > { %s1262_s23 = smov (%p31_p0, %s29_s23), 0  ;;  %p151_p5 = scmp.eq.s32.totalorder %s767_s22, 1 }
   0x9   : > { %p1114_p4 = por %p145_p2, %p144_p1  ;;  %s131_s26 = ssub.s32 %s1041_s19, %s1262_s23 }
   0xa   : > { %p770_p6 = scmp.ge.s32.totalorder %s1045_s20, 1  ;;  %p132_p7 = scmp.eq.s32.totalorder %s131_s26, 0 }
   0xb   : > { %p1121_p8 = por %p151_p5, %p150_p3  ;;  %p201_p9 = scmp.lt.s32.totalorder %s1045_s20, 3 }
   0xc   : > { %s1127_s28 = scalar_select %p132_p7, %s1033_s17, %s134_s24  }
   0xd   : > { %p202_p10 = pnand %p770_p6, %p201_p9 }
   0xe   : > { %p240_p11 = scmp.lt.s32.totalorder (!%p202_p10), %s1037_s18, 1  ;;  %s792_s21 = sshll.u32 (!%p202_p10), %s1037_s18, 4 }
   0xf   : > { %205 = sbr.rel (%p202_p10) target bundleno = 492 (0x1ec), region = 36  ;;  %s677_s30 = scalar_lea.hbm (!%p202_p10), %s1253_s4, %s792_s21 }
  0x14   : > { %v919_v0 = vld [vmem:[%s1251_s2 + $0x38] sm:$0xff]   ;;  %v920_v1 = vld [vmem:[%s1251_s2 + $0x30] sm:$0xff]   ;;  %s241_s7 = scalar_select %p240_p11, %s1037_s18, 1  ;;  %v921_v2 = vld [vmem:[%s1251_s2 + $0x28] sm:$0xff]   ;;  %v1047_v3 = vmov 0   ;;  %vm658_vm0 = vcmask 1040384  }
  0x15   : > { %813 = vmatprep.subr.bf16.mxu0 %v919_v0  ;;  %845 = vmatprep.subr.bf16.mxu1 %v919_v0  ;;  %v922_v4 = vld [vmem:[%s1251_s2 + $0x20] sm:$0xff]   ;;  %v923_v7 = vld [vmem:[%s1251_s2 + $0x18] sm:$0xff]   ;;  %v924_v8 = vld [vmem:[%s1251_s2 + $0x10] sm:$0xff]  }
  0x16   : > { %814 = vmatpush3.bf16.msra.mxu0 %v919_v0  ;;  %853 = vmatpush3.bf16.msra.mxu1 %v919_v0  ;;  %s796_s10 = sshll.u32 %s241_s7, 6  ;;  %s795_s22 = sshll.u32 %s241_s7, 7  ;;  %v925_v13 = vld [vmem:[%s1251_s2 + $0x8] sm:$0xff]   ;;  %v926_v16 = vld [vmem:[%s1251_s2] sm:$0xff]  }
  0x17   : > { %815 = vmatprep.subr.bf16.mxu0 %v920_v1  ;;  %846 = vmatprep.subr.bf16.mxu1 %v920_v1  ;;  %s1143_s13 = scalar_lea.vmem %s1250_s1, %s796_s10  ;;  %s1156_s5 = scalar_lea.vmem %s1249_s0, %s795_s22  ;;  %v1192_v35 = vld [vmem:[%s1252_s3] ss:$0 sm:$0xff] }
  0x18   : > { %917 = vset.pattern.permute.xlu0 %v1047_v3  ;;  %918 = vset.pattern.permute.xlu1 %v1047_v3  ;;  %v927_v5 = vld [vmem:[%s1143_s13] sm:$0xff]   ;;  %v510_v10 = vld [vmem:[%s1156_s5 + $0x10] sm:$0xff]  ;;  %v509_v11 = vld [vmem:[%s1156_s5 + $0x8] sm:$0xff]  ;;  %s1048_s7 = smov [#allocation3]  }
  0x19   : > { %v928_v6 = vld [vmem:[%s1143_s13 + $0x20] sm:$0xff]   ;;  %829 = vmatprep.mubr.bf16.mxu0 %v927_v5  ;;  %536 = vperm.xlu1 %918, %v510_v10   ;;  %v511_v12 = vld [vmem:[%s1156_s5 + $0x18] sm:$0xff]  ;;  %v513_v15 = vld [vmem:[%s1156_s5 + $0x28] sm:$0xff]  ;;  %s973_s8 = sshll.u32 %s1048_s7, 4  ;;  %s974_s8 = int_to_ptr.vmem [resolvable:$false] %s973_s8 }
  0x1a   : > { %816 = vmatpush3.bf16.msra.mxu0 %v920_v1  ;;  %854 = vmatpush3.bf16.msra.mxu1 %v920_v1  ;;  %v508_v9 = vld [vmem:[%s1156_s5] sm:$0xff]  ;;  %v514_v17 = vld [vmem:[%s1156_s5 + $0x30] sm:$0xff]  ;;  %v515_v18 = vld [vmem:[%s1156_s5 + $0x38] sm:$0xff]  ;;  %s975_s18 = scalar_lea.vmem %s974_s8, 32 }
  0x1b   : > { %817 = vmatprep.subr.bf16.mxu0 %v921_v2  ;;  %847 = vmatprep.subr.bf16.mxu1 %v921_v2  ;;  %v512_v14 = vld [vmem:[%s1156_s5 + $0x20] sm:$0xff]  ;;  %v929_v19 = vld [vmem:[%s1143_s13 + $0x8] sm:$0xff]   ;;  %v931_v23 = vld [vmem:[%s1143_s13 + $0x10] sm:$0xff]  }
  0x1c   : > { %837 = vmatprep.mubr.bf16.mxu1 %v928_v6  ;;  %526 = vperm.xlu0 %917, %v508_v9   ;;  %v930_v20 = vld [vmem:[%s1143_s13 + $0x28] sm:$0xff]   ;;  %v516_v21 = vld [vmem:[%s1156_s5 + $0x40] sm:$0xff]  ;;  %v932_v24 = vld [vmem:[%s1143_s13 + $0x30] sm:$0xff]  }
  0x1d   : > { %541 = vperm.xlu1 %918, %v511_v12   ;;  %v517_v22 = vld [vmem:[%s1156_s5 + $0x48] sm:$0xff]  ;;  %v518_v25 = vld [vmem:[%s1156_s5 + $0x50] sm:$0xff]  ;;  %v519_v26 = vld [vmem:[%s1156_s5 + $0x58] sm:$0xff] }
  0x1e   : > { %818 = vmatpush3.bf16.msra.mxu0 %v921_v2  ;;  %855 = vmatpush3.bf16.msra.mxu1 %v921_v2  ;;  %v933_v27 = vld [vmem:[%s1143_s13 + $0x18] sm:$0xff]   ;;  %v520_v29 = vld [vmem:[%s1156_s5 + $0x60] sm:$0xff]  ;;  %v521_v30 = vld [vmem:[%s1156_s5 + $0x68] sm:$0xff] }
  0x1f   : > { %819 = vmatprep.subr.bf16.mxu0 %v922_v4  ;;  %848 = vmatprep.subr.bf16.mxu1 %v922_v4  ;;  %v934_v28 = vld [vmem:[%s1143_s13 + $0x38] sm:$0xff]   ;;  %v522_v31 = vld [vmem:[%s1156_s5 + $0x70] sm:$0xff]  ;;  %s237_s13 = sand.u32 1, %s1029_s16  }
  0x20   : > { %531 = vperm.xlu0 %917, %v509_v11   ;;  %v523_v32 = vld [vmem:[%s1156_s5 + $0x78] sm:$0xff]  ;;  %s238_s22 = scalar_lea.vmem [#allocation3], %s237_s13  ;;  %s667_s5 = scalar_lea.sflag [#allocation4], %s237_s13 }
  0x21   : > { %551 = vperm.xlu1 %918, %v513_v15   ;;  %s679_s24 = sshll.u32 %s238_s22, 4  ;;  %s680_s24 = int_to_ptr.vmem [resolvable:$true] %s679_s24 }
  0x22   : > { %820 = vmatpush3.bf16.msra.mxu0 %v922_v4  ;;  %856 = vmatpush3.bf16.msra.mxu1 %v922_v4  ;;  %s969_s6 = scalar_lea.vmem %s680_s24, 16  ;;  %p976_p1 = scmp.lt.s32.totalorder %s680_s24, %s974_s8 }
  0x23   : > { %821 = vmatprep.subr.bf16.mxu0 %v923_v7  ;;  %849 = vmatprep.subr.bf16.mxu1 %v923_v7  ;;  %p970_p12 = scmp.ne.s32.totalorder %s680_s24, %s969_s6  ;;  %p977_p2 = scmp.lt.s32.totalorder %s975_s18, %s969_s6 }
  0x24   : > { %546 = vperm.xlu0 %917, %v512_v14  }
  0x25   : > { %561 = vperm.xlu1 %918, %v515_v18   ;;  %p971_p13 = pnand %p970_p12, %p1114_p4  ;;  %p978_p3 = por %p977_p2, %p976_p1 }
  0x26   : > { %822 = vmatpush3.bf16.msra.mxu0 %v923_v7  ;;  %857 = vmatpush3.bf16.msra.mxu1 %v923_v7 }
  0x27   : > { %823 = vmatprep.subr.bf16.mxu0 %v924_v8  ;;  %850 = vmatprep.subr.bf16.mxu1 %v924_v8  ;;  %p972_p0 = pneg %p971_p13 }
  0x28   : > { %556 = vperm.xlu0 %917, %v514_v17  }
  0x29   : > { %571 = vperm.xlu1 %918, %v517_v22   ;;  %p979_p5 = pnand %p978_p3, %p972_p0 }
  0x2a   : > { %824 = vmatpush3.bf16.msra.mxu0 %v924_v8  ;;  %858 = vmatpush3.bf16.msra.mxu1 %v924_v8 }
  0x2b   : > { %825 = vmatprep.subr.bf16.mxu0 %v925_v13  ;;  %851 = vmatprep.subr.bf16.mxu1 %v925_v13 }
  0x2c   : > { %566 = vperm.xlu0 %917, %v516_v21  }
  0x2d   : > { %581 = vperm.xlu1 %918, %v519_v26  }
  0x2e   : > { %826 = vmatpush3.bf16.msra.mxu0 %v925_v13  ;;  %859 = vmatpush3.bf16.msra.mxu1 %v925_v13 }
  0x2f   : > { %827 = vmatprep.subr.bf16.mxu0 %v926_v16  ;;  %852 = vmatprep.subr.bf16.mxu1 %v926_v16 }
  0x30   : > { %576 = vperm.xlu0 %917, %v518_v25  }
  0x31   : > { %591 = vperm.xlu1 %918, %v521_v30  }
  0x32   : > { %828 = vmatpush3.bf16.msra.mxu0 %v926_v16  ;;  %860 = vmatpush3.bf16.msra.mxu1 %v926_v16 }
  0x34   : > { %586 = vperm.xlu0 %917, %v520_v29  }
  0x35   : > { %830 = vmatmul.mubr.bf16.vlgmr.msra.gmra.mxu0 %v929_v19  ;;  %838 = vmatmul.mubr.bf16.vlgmr.msra.gmra.mxu1 %v930_v20 }
  0x36   : > { %833 = vmatprep.mubr.bf16.mxu0 %v931_v23  ;;  %841 = vmatprep.mubr.bf16.mxu1 %v932_v24 }
  0x37   : > { %601 = vperm.xlu1 %918, %v523_v32  }
  0x38   : > { %596 = vperm.xlu0 %917, %v522_v31  }
  0x3d   : > { %834 = vmatmul.mubr.bf16.gmra.mxu0 %v933_v27  ;;  %842 = vmatmul.mubr.bf16.gmra.mxu1 %v934_v28 }
  0x94   : > { %v537_v44 = vpop.permute.xlu1 %536 }
  0x97   : > { %v527_v42 = vpop.permute.xlu0 %526 }
  0x98   : > { %v542_v55 = vpop.permute.xlu1 %541 }
  0x9b   : > { %v532_v50 = vpop.permute.xlu0 %531 }
  0x9c   : > { %v552_v0 = vpop.permute.xlu1 %551 }
  0x9f   : > { %v547_v61 = vpop.permute.xlu0 %546 }
  0xa0   : > { %v562_v15 = vpop.permute.xlu1 %561 }
  0xa3   : > { %v557_v9 = vpop.permute.xlu0 %556 }
  0xa4   : > { %v572_v29 = vpop.permute.xlu1 %571 }
  0xa7   : > { %v567_v24 = vpop.permute.xlu0 %566 }
  0xf5   : > { %v831_v33 = vpop.f32.mrf.mxu0  ;;  %v839_v34 = vpop.f32.mrf.mxu1 }
  0xf6   : > { %v438_v39 = vadd.f32 %v831_v33, %v1192_v35  ;;  %v470_v3 = vadd.f32 %v839_v34, %v1192_v35 }
  0xf7   : > { %v429_v36 = vpop.f32.mrf.mxu0  ;;  %v461_v37 = vpop.f32.mrf.mxu1 }
  0xf8   : > { %v430_v38 = vadd.f32 %v1192_v35, %v429_v36  ;;  %v462_v60 = vadd.f32 %v1192_v35, %v461_v37  ;;  %v577_v37 = vpop.permute.xlu0 %576 }
  0xf9   : > { %v832_v40 = vpop.f32.mrf.mxu0  ;;  %v840_v41 = vpop.f32.mrf.mxu1 }
  0xfa   : > { %935 = vtanh.f32 %v430_v38  ;;  %v441_v45 = vadd.f32 %v832_v40, %v1192_v35  ;;  %v473_v6 = vadd.f32 %v840_v41, %v1192_v35  ;;  %v582_v41 = vpop.permute.xlu1 %581 }
  0xfb   : > { %v432_v43 = vpop.f32.mrf.mxu0  ;;  %937 = vtanh.f32 %v438_v39  ;;  %v464_v47 = vpop.f32.mrf.mxu1 }
  0xfc   : > { %v433_v46 = vadd.f32 %v1192_v35, %v432_v43  ;;  %v465_v62 = vadd.f32 %v1192_v35, %v464_v47  ;;  %v587_v47 = vpop.permute.xlu0 %586 }
  0xfd   : > { %v835_v48 = vpop.f32.mrf.mxu0  ;;  %v843_v53 = vpop.f32.mrf.mxu1 }
  0xfe   : > { %939 = vtanh.f32 %v433_v46  ;;  %v454_v52 = vadd.f32 %v835_v48, %v1192_v35  ;;  %v486_v20 = vadd.f32 %v843_v53, %v1192_v35 }
  0xff   : > { %v445_v49 = vpop.f32.mrf.mxu0  ;;  %941 = vtanh.f32 %v441_v45  ;;  %v477_v59 = vpop.f32.mrf.mxu1 }
 0x100   : > { %v446_v51 = vadd.f32 %v1192_v35, %v445_v49  ;;  %v478_v13 = vadd.f32 %v1192_v35, %v477_v59 }
 0x101   : > { %v836_v54 = vpop.f32.mrf.mxu0  ;;  %v844_v1 = vpop.f32.mrf.mxu1 }
 0x102   : > { %943 = vtanh.f32 %v446_v51  ;;  %v457_v57 = vadd.f32 %v836_v54, %v1192_v35  ;;  %v489_v25 = vadd.f32 %v844_v1, %v1192_v35  ;;  %v592_v51 = vpop.permute.xlu1 %591 }
 0x103   : > { %v448_v56 = vpop.f32.mrf.mxu0  ;;  %945 = vtanh.f32 %v454_v52  ;;  %v480_v10 = vpop.f32.mrf.mxu1 }
 0x104   : > { %v449_v58 = vadd.f32 %v1192_v35, %v448_v56  ;;  %v481_v18 = vadd.f32 %v1192_v35, %v480_v10 }
 0x106   : > { %947 = vtanh.f32 %v449_v58  ;;  %v597_v58 = vpop.permute.xlu0 %596 }
 0x107   : > { %949 = vtanh.f32 %v457_v57  ;;  %v936_v63 = vpop.eup %935 }
 0x108   : > { %v938_v2 = vpop.eup %937  ;;  %951 = vtanh.f32 %v462_v60  ;;  %v604_v5 = vmul.f32 %v936_v63, %v527_v42 }
 0x109   : > { %953 = vtanh.f32 %v465_v62  ;;  %v606_v11 = vmul.f32 %v938_v2, %v537_v44 }
 0x10a   : > { %955 = vtanh.f32 %v470_v3 }
 0x10b   : > { %v940_v4 = vpop.eup %939  ;;  %957 = vtanh.f32 %v473_v6 }
 0x10c   : > { %v605_v7 = vmul.f32 %v940_v4, %v532_v50  ;;  %v942_v8 = vpop.eup %941  ;;  %959 = vtanh.f32 %v478_v13 }
 0x10d   : > { %v607_v16 = vmul.f32 %v942_v8, %v542_v55  ;;  %961 = vtanh.f32 %v481_v18 }
 0x10e   : > { %v620_v12 = vadd.f32 %v605_v7, %v604_v5  ;;  %963 = vtanh.f32 %v486_v20 }
 0x10f   : > { %v944_v14 = vpop.eup %943  ;;  %965 = vtanh.f32 %v489_v25 }
 0x110   : > { %v621_v17 = vadd.f32 %v620_v12, %v606_v11  ;;  %v946_v19 = vpop.eup %945  ;;  %v608_v21 = vmul.f32 %v944_v14, %v547_v61  ;;  %v602_v61 = vpop.permute.xlu1 %601 }
 0x111   : > { %v610_v30 = vmul.f32 %v946_v19, %v557_v9 }
 0x112   : > { %v622_v22 = vadd.f32 %v621_v17, %v607_v16 }
 0x113   : > { %v948_v23 = vpop.eup %947 }
 0x114   : > { %v609_v26 = vmul.f32 %v948_v23, %v552_v0  ;;  %v623_v27 = vadd.f32 %v622_v22, %v608_v21  ;;  %v950_v28 = vpop.eup %949 }
 0x115   : > { %v952_v32 = vpop.eup %951  ;;  %v611_v33 = vmul.f32 %v950_v28, %v562_v15 }
 0x116   : > { %v624_v31 = vadd.f32 %v623_v27, %v609_v26  ;;  %v954_v36 = vpop.eup %953  ;;  %v612_v38 = vmul.f32 %v952_v32, %v567_v24 }
 0x117   : > { %v956_v40 = vpop.eup %955  ;;  %v613_v42 = vmul.f32 %v954_v36, %v572_v29 }
 0x118   : > { %v625_v34 = vadd.f32 %v624_v31, %v610_v30  ;;  %v958_v43 = vpop.eup %957  ;;  %v614_v44 = vmul.f32 %v956_v40, %v577_v37 }
 0x119   : > { %v960_v46 = vpop.eup %959  ;;  %v615_v48 = vmul.f32 %v958_v43, %v582_v41 }
 0x11a   : > { %v626_v39 = vadd.f32 %v625_v34, %v611_v33  ;;  %v962_v50 = vpop.eup %961  ;;  %v616_v53 = vmul.f32 %v960_v46, %v587_v47 }
 0x11b   : > { %v964_v54 = vpop.eup %963  ;;  %v617_v56 = vmul.f32 %v962_v50, %v592_v51 }
 0x11c   : > { %v627_v35 = vadd.f32 %v626_v39, %v612_v38  ;;  %v966_v57 = vpop.eup %965  ;;  %v618_v60 = vmul.f32 %v964_v54, %v597_v58 }
 0x11d   : > { %v619_v63 = vmul.f32 %v966_v57, %v602_v61 }
 0x11e   : > { %v628_v45 = vadd.f32 %v627_v35, %v613_v42 }
 0x120   : > { %v629_v49 = vadd.f32 %v628_v45, %v614_v44 }
 0x122   : > { %v630_v52 = vadd.f32 %v629_v49, %v615_v48 }
 0x124   : > { %v631_v55 = vadd.f32 %v630_v52, %v616_v53 }
 0x126   : > { %v632_v59 = vadd.f32 %v631_v55, %v617_v56 }
 0x128   : > { %v633_v62 = vadd.f32 %v632_v59, %v618_v60 }
 0x12a   : > { %v634_v0 = vadd.f32 %v633_v62, %v619_v63 }
 0x12c   : > { %v635_v1 = vrot.slane %v634_v0, 4 }
 0x12e   : > { %v636_v2 = vadd.f32 %v635_v1, %v634_v0 }
 0x130   : > { %v637_v3 = vrot.slane %v636_v2, 2 }
 0x132   : > { %v638_v4 = vadd.f32 %v637_v3, %v636_v2 }
 0x134   : > { %v639_v5 = vrot.slane %v638_v4, 1 }
 0x136   : > { %v640_v6 = vadd.f32 %v639_v5, %v638_v4 }
 0x138   : > { %645 = vst [vmem:[#allocation2] sm:$0x1] %v640_v6 }
 0x13f   : > { %v656_v7 = vld [vmem:[#allocation2] sm:$0x1] }
 0x140   : > { %v657_v8 = vmul.f32 %v656_v7, %v656_v7 }
 0x142   : > { %v659_v9 = vsel %vm658_vm0, %v657_v8, 0.0 }
 0x143   : > { %660 = vadd.xlane.f32.xlu0 %v659_v9 }
 0x1cc   : > { %v661_v10 = vpop.xlane.xlu0 %660 }
 0x1cd   : > { %v662_v11 = vmax.f32 %v661_v10, 1e-24 }
 0x1cf   : > { %967 = vrsqrt.f32 %v662_v11 }
 0x1dc   : > { %v968_v12 = vpop.eup %967 }
 0x1dd   : > { %v664_v13 = vmul.f32 %v968_v12, %v656_v7 }
 0x1df   : > { %665 = vst [vmem:[%s238_s22] sm:$0x1] %v664_v13 }
 0x1e0   : > { %982 = shalt.err (!%p979_p5)
}
 0x1e1   : > { %s983_s9 = scalar_lea.hbm %s677_s30, 16  ;;  %s987_s12 = scalar_lea.hbm %s1253_s4, 32 }
 0x1e2   : > { %p984_p6 = scmp.ne.s32.totalorder %s677_s30, %s983_s9  ;;  %p988_p10 = scmp.lt.s32.totalorder %s677_s30, %s1253_s4 }
 0x1e3   : > { %p989_p11 = scmp.lt.s32.totalorder %s987_s12, %s983_s9 }
 0x1e4   : > { %p985_p7 = pnand %p984_p6, %p1114_p4 }
 0x1e5   : > { %p990_p12 = por %p989_p11, %p988_p10 }
 0x1e6   : > { %p986_p9 = pneg %p985_p7 }
 0x1e8   : > { %p991_p13 = pnand %p990_p12, %p986_p9 }
 0x1ea   : > { %994 = shalt.err (!%p991_p13)
}
 0x1eb   : > { %861 = dma.vmem_to_hbm [thread:$0]  (%p1114_p4), %s680_s24, 16, %s677_s30, %s667_s5  }
 0x1ec PF: > { %p867_p0 = scmp.ge.s32.totalorder %s1045_s20, 2  ;;  %s691_s21 = sand.u32 1, %s1025_s15  }
 0x1ed   : > { %s692_s22 = scalar_lea.sflag [#allocation4], %s691_s21 }
 0x1ee   : > { %p864_p1 = pnand %p867_p0, %p1121_p8 }
 0x1f0   : > { %p865_p2 = pneg %p864_p1 }
 0x1f2   : > { %1020 = dma.done.wait (%p865_p2), %s692_s22, 16  }
 0x1f3   : > { %1022 = vsyncadd (%p865_p2), %s692_s22, 4294967280  ;;  %s17_s20 = sadd.s32 1, %s1045_s20   ;;  %s1256_s15 = smov %s1029_s16 }
 0x1f4   : > { %p14_p3 = scmp.ge.s32.totalorder %s17_s20, 4   ;;  %s1257_s16 = smov %s1033_s17 }
 0x1f5   : > { %s1258_s17 = smov %s1127_s28  ;;  %s1259_s18 = smov %s1041_s19 }
 0x1f6   : > { %s1260_s19 = smov %s1262_s23  ;;  %16 = sbr.rel (!%p14_p3) target bundleno = 4 (0x4), region = 86 }
 0x1fb   :  { %696 = vsyncpa [#allocation4], 1 }
 0x1fc   :  { %698 = vsyncpa [#allocation4 + $0x1], 1 }

</bundles_post_ra>
